<compile_context>
chip_gen: v7x
topology: tpu7x:2x2x1
jax: 0.10.0
libtpu: 0.0.40
codegen_flags: <defaults>
</compile_context>

<pallas_src>
import jax
import jax.numpy as jnp
from jax.experimental import pallas as pl
from jax.experimental.pallas import tpu as pltpu


_LANE = 128   # vreg lane width (last dim)


def _round_up(x, m):
    return (x + m - 1) // m * m


def _pick_tile(total, target):
    """Largest multiple of 128 that divides `total` and is <= target."""
    best = _LANE
    t = _LANE
    limit = min(total, max(target, _LANE))
    while t <= limit:
        if total % t == 0:
            best = t
        t += _LANE
    return best


def _vmem_budget():
    """(tile-sizing budget, vmem_limit_bytes handed to Mosaic), per chip."""
    cap = 64 * 1024 * 1024            # conservative fallback (v7x per-core VMEM)
    try:
        info = pltpu.get_tpu_info()
        cap = int(getattr(info, "vmem_capacity_bytes", cap)) or cap
    except Exception:
        pass
    budget = int(cap * 0.70)          # what the tile selector is allowed to use
    limit = min(int(cap * 0.85), 100 * 1024 * 1024)
    return budget, limit


def _vmem_bytes(tm, tk, tn, gk, c_item, o_item, w_bufs):
    x_b = 2 * tm * tk * c_item            # double-buffered activations
    w_b = w_bufs * tk * tn * c_item       # weight tile (1 buffer when resident)
    b_b = w_bufs * tn * 4                 # f32 bias tile
    o_b = 2 * tm * tn * o_item            # double-buffered output
    acc = tm * tn * 4 if gk > 1 else 0    # f32 accumulator scratch
    return x_b + w_b + b_b + o_b + acc


def _bspec(shape, index_map, mode=None):
    if mode is None:
        return pl.BlockSpec(shape, index_map)
    return pl.BlockSpec(shape, index_map, pipeline_mode=mode)


# ---------------------------------------------------------------------------
# Kernels
# ---------------------------------------------------------------------------

def _mlp_kernel(x_ref, w_ref, b_ref, o_ref):
    # x: (tm, K)  w: (K, tn)  b: (1, tn)  o: (tm, tn)
    acc = jnp.dot(x_ref[...], w_ref[...], preferred_element_type=jnp.float32)
    acc = acc + b_ref[...].astype(jnp.float32)      # VPU slot: hidden under MXU
    # f32 tanh epilogue (v5e's EUP has no bf16 path).  If the layer output were
    # bf16 on v6e/v7x, tanh could be done in bf16 for ~2x EUP throughput.
    o_ref[...] = jnp.tanh(acc).astype(o_ref.dtype)  # EUP slot: free filler


def _mlp_kernel_ktiled(x_ref, w_ref, b_ref, o_ref, acc_ref):
    # Contraction tiled along the trailing "arbitrary" grid axis.
    k = pl.program_id(2)

    @pl.when(k == 0)
    def _():
        acc_ref[...] = jnp.zeros_like(acc_ref)

    acc_ref[...] += jnp.dot(x_ref[...], w_ref[...],
                            preferred_element_type=jnp.float32)

    @pl.when(k == pl.num_programs(2) - 1)
    def _():
        acc = acc_ref[...] + b_ref[...].astype(jnp.float32)
        o_ref[...] = jnp.tanh(acc).astype(o_ref.dtype)


# ---------------------------------------------------------------------------
# Wrappers
# ---------------------------------------------------------------------------

def prepare_mlp_block_params(weight, bias, compute_dtype=jnp.bfloat16):
    """Transpose / zero-pad / cast the nn.Linear parameters ONCE (init time).

    weight: (output_dim, input_dim)   -- PyTorch nn.Linear layout
    bias:   (output_dim,)
    Returns (W^T padded, bias padded (1,N) f32, output_dim).
    """
    output_dim, input_dim = weight.shape
    K = _round_up(input_dim, _LANE)
    N = _round_up(output_dim, _LANE)
    w_p = jnp.pad(weight.T.astype(compute_dtype),
                  ((0, K - input_dim), (0, N - output_dim)))
    # Bias stays f32: the epilogue is f32 on all generations.
    b_p = jnp.pad(bias.astype(jnp.float32), (0, N - output_dim)).reshape(1, N)
    return w_p, b_p, int(output_dim)


def mlp_block_apply(x, w_p, b_p, output_dim, *, tm=512, tn=256, tk=1024,
                    max_resident_weight_bytes=None):
    """out = tanh(x @ W^T + b) using the pre-prepared (padded) parameters."""
    lead_shape = x.shape[:-1]
    input_dim = x.shape[-1]
    x2 = x.reshape(-1, input_dim)
    batch = x2.shape[0]
    K, N = w_p.shape
    assert input_dim <= K and b_p.shape == (1, N)

    compute_dtype = w_p.dtype
    out_dtype = x.dtype
    c_item = jnp.dtype(compute_dtype).itemsize
    o_item = jnp.dtype(out_dtype).itemsize
    sub = 16 if c_item < 4 else 8          # sub-32-bit dtypes pack 2x sublanes

    budget, vmem_limit = _vmem_budget()
    if max_resident_weight_bytes is None:
        max_resident_weight_bytes = budget // 3

    # --- weight residency / K,N tiling -------------------------------------
    resident = K * N * c_item <= max_resident_weight_bytes
    if resident:
        tn_s, tk_s = N, K
        w_bufs = 1                         # block never changes -> 1 buffer
    else:
        tn_s = _pick_tile(N, tn)
        tk_s = _pick_tile(K, tk)
        w_bufs = 2
    gN, gK = N // tn_s, K // tk_s

    # --- row tile: as large as batch / VMEM allow ---------------------------
    tm_s = min(_round_up(tm, sub), _round_up(batch, sub))
    while tm_s > sub and _vmem_bytes(tm_s, tk_s, tn_s, gK,
                                     c_item, o_item, w_bufs) > budget:
        tm_s = _round_up(tm_s // 2, sub)
    M = _round_up(batch, tm_s)
    gM = M // tm_s

    # --- keep both v7x TensorCores busy: >= 2 steps on a parallel axis ------
    if gM * gN == 1 and tm_s >= 2 * sub:
        tm_s = _round_up(tm_s // 2, sub)
        M = _round_up(batch, tm_s)
        gM = M // tm_s

    # --- per-call padding of the activations only ---------------------------
    x_p = jnp.pad(x2.astype(compute_dtype),
                  ((0, M - batch), (0, K - input_dim)))

    # --- grid / index maps ---------------------------------------------------
    # With the row axis outer, x is read once and W is re-read gM times; swap
    # the order when tm < tn so the larger re-read traffic is avoided.
    swap = tm_s < tn_s
    if gK == 1:
        kernel = _mlp_kernel
        scratch = []
        dims = ("parallel", "parallel")
        if not swap:
            grid = (gM, gN)
            x_map = lambda i, j: (i, 0)
            w_map = lambda i, j: (0, j)
            b_map = lambda i, j: (0, j)
            o_map = lambda i, j: (i, j)
        else:
            grid = (gN, gM)
            x_map = lambda j, i: (i, 0)
            w_map = lambda j, i: (0, j)
            b_map = lambda j, i: (0, j)
            o_map = lambda j, i: (i, j)
    else:
        kernel = _mlp_kernel_ktiled
        scratch = [pltpu.VMEM((tm_s, tn_s), jnp.float32)]
        dims = ("parallel", "parallel", "arbitrary")
        if not swap:
            grid = (gM, gN, gK)
            x_map = lambda i, j, k: (i, k)
            w_map = lambda i, j, k: (k, j)
            b_map = lambda i, j, k: (0, j)
            o_map = lambda i, j, k: (i, j)
        else:
            grid = (gN, gM, gK)
            x_map = lambda j, i, k: (i, k)
            w_map = lambda j, i, k: (k, j)
            b_map = lambda j, i, k: (0, j)
            o_map = lambda j, i, k: (i, j)

    def _launch(single_buffer_weights):
        mode = pl.Buffered(1) if single_buffer_weights else None
        return pl.pallas_call(
            kernel,
            out_shape=jax.ShapeDtypeStruct((M, N), out_dtype),
            grid=grid,
            in_specs=[
                _bspec((tm_s, tk_s), x_map),            # activations
                _bspec((tk_s, tn_s), w_map, mode),      # W^T tile
                _bspec((1, tn_s), b_map, mode),         # bias tile
            ],
            out_specs=pl.BlockSpec((tm_s, tn_s), o_map),
            scratch_shapes=scratch,
            compiler_params=pltpu.CompilerParams(
                dimension_semantics=dims,
                vmem_limit_bytes=vmem_limit),
        )(x_p, w_p, b_p)

    if resident:
        try:
            out = _launch(True)
        except Exception:
            # pl.Buffered(1) not accepted by this jax/Mosaic: default buffering.
            out = _launch(False)
    else:
        out = _launch(False)

    return out[:batch, :output_dim].reshape(*lead_shape, output_dim)


def mlp_block(x, weight, bias, compute_dtype=jnp.bfloat16, **tile_kwargs):
    """One-shot convenience wrapper (re-prepares parameters on every call)."""
    w_p, b_p, output_dim = prepare_mlp_block_params(weight, bias, compute_dtype)
    return mlp_block_apply(x, w_p, b_p, output_dim, **tile_kwargs)


def mlp_block_ref(x, weight, bias):
    return jnp.tanh(x @ weight.T + bias)


if __name__ == "__main__":
    key = jax.random.PRNGKey(0)
    kx, kw, kb = jax.random.split(key, 3)

    # DeepONet branch-net sized layer.
    batch, input_dim, output_dim = 16, 64, 32

    x = jax.random.normal(kx, (batch, input_dim), dtype=jnp.float32)
    # Deterministic synthetic parameters mimicking PyTorch's Linear init.
    bound = 1.0 / jnp.sqrt(jnp.float32(input_dim))
    weight = jax.random.uniform(kw, (output_dim, input_dim), dtype=jnp.float32,
                                minval=-bound, maxval=bound)
    bias = jax.random.uniform(kb, (output_dim,), dtype=jnp.float32,
                              minval=-bound, maxval=bound)

    ref = mlp_block_ref(x, weight, bias)

    # 1) Exact f32 path (parameters prepared once, reused across calls).
    w32, b32, od = prepare_mlp_block_params(weight, bias,
                                            compute_dtype=jnp.float32)
    out32 = jax.block_until_ready(mlp_block_apply(x, w32, b32, od))
    assert out32.shape == (batch, output_dim)
    assert jnp.allclose(out32, ref, atol=1e-5, rtol=1e-5)

    # 2) Default bf16-MXU path (f32 accumulation + f32 epilogue).
    wbf, bbf, od = prepare_mlp_block_params(weight, bias)
    outbf = jax.block_until_ready(mlp_block_apply(x, wbf, bbf, od))
    assert outbf.shape == (batch, output_dim)
    assert jnp.allclose(outbf, ref, atol=1e-2, rtol=1e-2)

    # 3) Exercise the K-tiled accumulator kernel and the swapped grid order.
    k2, n2 = 256, 256
    x2 = jax.random.normal(kx, (batch, k2), dtype=jnp.float32)
    w2 = jax.random.uniform(kw, (n2, k2), dtype=jnp.float32,
                            minval=-0.05, maxval=0.05)
    b2 = jax.random.uniform(kb, (n2,), dtype=jnp.float32,
                            minval=-0.05, maxval=0.05)
    wp2, bp2, od2 = prepare_mlp_block_params(w2, b2)
    out2 = jax.block_until_ready(
        mlp_block_apply(x2, wp2, bp2, od2, tn=128, tk=128,
                        max_resident_weight_bytes=0))
    assert out2.shape == (batch, n2)
    assert jnp.allclose(out2, mlp_block_ref(x2, w2, b2), atol=1e-2, rtol=1e-2)

    print("KERNEL_OK")
</pallas_src>

<mosaic_0001>
module attributes {stable_mosaic.version = 11 : i64} {
  func.func @_mlp_kernel(%arg0: i32, %arg1: i32, %arg2: memref<8x128xf32, #tpu.memory_space<vmem>>, %arg3: memref<128x128xf32, #tpu.memory_space<vmem>>, %arg4: memref<1x128xf32, #tpu.memory_space<vmem>>, %arg5: memref<8x128xf32, #tpu.memory_space<vmem>>) attributes {dimension_semantics = [#tpu.dimension_semantics<parallel>, #tpu.dimension_semantics<parallel>], iteration_bounds = array<i64: 1, 2>, scalar_prefetch = 0 : i64, scratch_operands = 0 : i64, tpu.core_type = #tpu.core_type<tc>, window_params = [{transform_indices = @transform_0, window_bounds = array<i64: 8, 128>}, {pipeline_mode = #tpu.pipeline_mode<synchronous>, transform_indices = @transform_1, window_bounds = array<i64: 128, 128>}, {pipeline_mode = #tpu.pipeline_mode<synchronous>, transform_indices = @transform_2, window_bounds = array<i64: 1, 128>}, {transform_indices = @transform_3, window_bounds = array<i64: 8, 128>}]} {
    %c0 = arith.constant 0 : index
    %c0_0 = arith.constant 0 : index
    %0 = vector.load %arg2[%c0, %c0_0] : memref<8x128xf32, #tpu.memory_space<vmem>>, vector<8x128xf32>
    %c0_1 = arith.constant 0 : index
    %c0_2 = arith.constant 0 : index
    %1 = vector.load %arg3[%c0_1, %c0_2] : memref<128x128xf32, #tpu.memory_space<vmem>>, vector<128x128xf32>
    %cst = arith.constant dense<0.000000e+00> : vector<8x128xf32>
    %2 = tpu.matmul %0, %1, %cst {dimension_numbers = #tpu.dot_dimension_numbers<[1], [0], [0], [1], [0, 0, 1, 1], [], []>} : vector<8x128xf32>, vector<128x128xf32>, vector<8x128xf32> -> vector<8x128xf32>
    %c0_3 = arith.constant 0 : index
    %c0_4 = arith.constant 0 : index
    %3 = vector.load %arg4[%c0_3, %c0_4] : memref<1x128xf32, #tpu.memory_space<vmem>>, vector<1x128xf32>
    %4 = vector.broadcast %3 : vector<1x128xf32> to vector<8x128xf32>
    %5 = arith.addf %2, %4 : vector<8x128xf32>
    %6 = math.tanh %5 : vector<8x128xf32>
    %c0_5 = arith.constant 0 : index
    %c0_6 = arith.constant 0 : index
    %7 = vector.load %arg5[%c0_5, %c0_6] : memref<8x128xf32, #tpu.memory_space<vmem>>, vector<8x128xf32>
    tpu.vector_store %arg5[%c0_5, %c0_6], %6 {strides = array<i32>} : memref<8x128xf32, #tpu.memory_space<vmem>>, vector<8x128xf32>,
    return
  }
  func.func @transform_0(%arg0: i32, %arg1: i32) -> (i32, i32) {
    %c0_i32 = arith.constant 0 : i32
    %c0_i32_0 = arith.constant 0 : i32
    return %arg1, %c0_i32 : i32, i32
  }
  func.func @transform_1(%arg0: i32, %arg1: i32) -> (i32, i32) {
    %c0_i32 = arith.constant 0 : i32
    %c0_i32_0 = arith.constant 0 : i32
    return %c0_i32, %arg0 : i32, i32
  }
  func.func @transform_2(%arg0: i32, %arg1: i32) -> (i32, i32) {
    %c0_i32 = arith.constant 0 : i32
    %c0_i32_0 = arith.constant 0 : i32
    return %c0_i32, %arg0 : i32, i32
  }
  func.func @transform_3(%arg0: i32, %arg1: i32) -> (i32, i32) {
    %c0_i32 = arith.constant 0 : i32
    return %arg1, %arg0 : i32, i32
  }
}

module attributes {stable_mosaic.version = 11 : i64} {
  func.func @_mlp_kernel(%arg0: i32, %arg1: i32, %arg2: memref<8x128xf32, #tpu.memory_space<vmem>>, %arg3: memref<128x128xf32, #tpu.memory_space<vmem>>, %arg4: memref<1x128xf32, #tpu.memory_space<vmem>>, %arg5: memref<8x128xf32, #tpu.memory_space<vmem>>) attributes {dimension_semantics = [#tpu.dimension_semantics<parallel>, #tpu.dimension_semantics<parallel>], iteration_bounds = array<i64: 1, 2>, scalar_prefetch = 0 : i64, scratch_operands = 0 : i64, tpu.core_type = #tpu.core_type<tc>, window_params = [{transform_indices = @transform_0, window_bounds = array<i64: 8, 128>}, {transform_indices = @transform_1, window_bounds = array<i64: 128, 128>}, {transform_indices = @transform_2, window_bounds = array<i64: 1, 128>}, {transform_indices = @transform_3, window_bounds = array<i64: 8, 128>}]} {
    %c0 = arith.constant 0 : index
    %c0_0 = arith.constant 0 : index
    %0 = vector.load %arg2[%c0, %c0_0] : memref<8x128xf32, #tpu.memory_space<vmem>>, vector<8x128xf32>
    %c0_1 = arith.constant 0 : index
    %c0_2 = arith.constant 0 : index
    %1 = vector.load %arg3[%c0_1, %c0_2] : memref<128x128xf32, #tpu.memory_space<vmem>>, vector<128x128xf32>
    %cst = arith.constant dense<0.000000e+00> : vector<8x128xf32>
    %2 = tpu.matmul %0, %1, %cst {dimension_numbers = #tpu.dot_dimension_numbers<[1], [0], [0], [1], [0, 0, 1, 1], [], []>} : vector<8x128xf32>, vector<128x128xf32>, vector<8x128xf32> -> vector<8x128xf32>
    %c0_3 = arith.constant 0 : index
    %c0_4 = arith.constant 0 : index
    %3 = vector.load %arg4[%c0_3, %c0_4] : memref<1x128xf32, #tpu.memory_space<vmem>>, vector<1x128xf32>
    %4 = vector.broadcast %3 : vector<1x128xf32> to vector<8x128xf32>
    %5 = arith.addf %2, %4 : vector<8x128xf32>
    %6 = math.tanh %5 : vector<8x128xf32>
    %c0_5 = arith.constant 0 : index
    %c0_6 = arith.constant 0 : index
    %7 = vector.load %arg5[%c0_5, %c0_6] : memref<8x128xf32, #tpu.memory_space<vmem>>, vector<8x128xf32>
    tpu.vector_store %arg5[%c0_5, %c0_6], %6 {strides = array<i32>} : memref<8x128xf32, #tpu.memory_space<vmem>>, vector<8x128xf32>,
    return
  }
  func.func @transform_0(%arg0: i32, %arg1: i32) -> (i32, i32) {
    %c0_i32 = arith.constant 0 : i32
    %c0_i32_0 = arith.constant 0 : i32
    return %arg1, %c0_i32 : i32, i32
  }
  func.func @transform_1(%arg0: i32, %arg1: i32) -> (i32, i32) {
    %c0_i32 = arith.constant 0 : i32
    %c0_i32_0 = arith.constant 0 : i32
    return %c0_i32, %arg0 : i32, i32
  }
  func.func @transform_2(%arg0: i32, %arg1: i32) -> (i32, i32) {
    %c0_i32 = arith.constant 0 : i32
    %c0_i32_0 = arith.constant 0 : i32
    return %c0_i32, %arg0 : i32, i32
  }
  func.func @transform_3(%arg0: i32, %arg1: i32) -> (i32, i32) {
    %c0_i32 = arith.constant 0 : i32
    return %arg1, %arg0 : i32, i32
  }
}

</mosaic_0001>

<bundles_post_ra>
// kernel: tpu_custom_call.1
= control target key start
LH: loop header
LB: loop body
LE: loop exit
PB: predicated region body
PF: predicated region fallthrough
CT: control target
= control target key end

     0   :  { %8 = vsyncpa [#allocation3], 0  ;;  %s1021_s0 = inlined_call_operand.hbm [shape: f32[16,128], index: 0, kind: input, shape index: {}]   ;;  %s1022_s1 = inlined_call_operand.hbm [shape: f32[128,128], index: 1, kind: input, shape index: {}]   ;;  %s1023_s2 = inlined_call_operand.vmem [shape: f32[1,128], index: 2, kind: input, shape index: {}]   ;;  %s1024_s3 = inlined_call_operand.hbm [shape: f32[16,128], index: 3, kind: output, shape index: {}]  }
   0x1   :  { %10 = vsyncpa [#allocation3 + $0x1], 0 }
   0x2   :  { %11 = vsyncpa [#allocation6], 0 }
   0x3   :  { %12 = vsyncpa [#allocation4], 0 }
   0x4   :  { %14 = vsyncpa [#allocation4 + $0x1], 0  ;;  %s797_s12 = smov 0   ;;  %s799_s13 = smov 0  }
   0x5   :  { %s801_s14 = smov 0   ;;  %s803_s15 = smov 0  }
   0x6   :  { %s805_s16 = smov 0   ;;  %s807_s17 = smov 0  }
   0x7 LB: > { %s450_s18 = sadd.s32 4294967295, %s767_s17   ;;  %s451_s19 = sadd.s32 4294967294, %s767_s17   ;;  %s767_s17 = sphi %s807_s17, %s20_s17   ;;  %s763_s16 = sphi %s805_s16, %s1048_s16   ;;  %s759_s15 = sphi %s803_s15, %s1047_s15   ;;  %s755_s14 = sphi %s801_s14, %s1046_s14   ;;  %s751_s13 = sphi %s799_s13, %s1045_s13   ;;  %s747_s12 = sphi %s797_s12, %s1044_s12  }
   0x8   : > { %p52_p0 = scmp.ne.s32.totalorder %s751_s13, %s747_s12  ;;  %p831_p1 = scmp.eq.s32.totalorder %s450_s18, 0 }
   0x9   : > { %p835_p2 = scmp.eq.s32.totalorder %s450_s18, 1  ;;  %p136_p3 = scmp.eq.s32.totalorder %s451_s19, 1 }
   0xa   : > { %s1029_s20 = scalar_select %p831_p1, 1, 0 }
   0xb   : > { %s1030_s21 = scalar_select %p835_p2, 1, 0 }
   0xc   : > { %p841_p4 = por %p831_p1, %p52_p0  ;;  %p452_p5 = scmp.ge.s32.totalorder %s767_s17, 1 }
   0xd   : > { %p846_p6 = por %p136_p3, %p52_p0  ;;  %p143_p7 = scmp.lt.s32.totalorder %s767_s17, 3 }
   0xe   : > { %s1031_s22 = scalar_select %p841_p4, 1, 0 }
   0xf   : > { %s1032_s23 = scalar_select %p846_p6, 1, 0 }
  0x10   : > { %p851_p8 = pnand %p452_p5, %p143_p7  ;;  %s769_s25 = smov [#allocation5]  }
  0x11   : > { %s157_s26 = sshll.u32 %s769_s25, 4  ;;  %s29_s28 = sadd.s32 1, %s763_s16  ;;  %s158_s26 = int_to_ptr.vmem [resolvable:$true] %s157_s26 }
  0x12   : > { %s1033_s24 = scalar_select %p851_p8, 1, 0 }
  0x13   : > { %p551_p9 = pneg %p851_p8  ;;  %s623_s4 = scalar_lea.hbm %s1022_s1, 2048 }
  0x14   : > { %p624_p12 = scmp.ne.s32.totalorder %s1022_s1, %s623_s4  ;;  %p630_p5 = scmp.lt.u32.totalorder %s623_s4, %s1022_s1 }
  0x15   : > { %p860_p11 = pnand %p551_p9, %p831_p1 }
  0x17   : > { %p625_p13 = pneg %p860_p11 }
  0x19   : > { %p626_p0 = pnand %p625_p13, %p624_p12 }
  0x1b   : > { %p627_p3 = pneg %p626_p0 }
  0x1d   : > { %p632_p7 = pnand %p630_p5, %p627_p3 }
  0x1f   : > { %635 = shalt.err (!%p632_p7)
}
  0x20   : > { %s636_s9 = scalar_lea.vmem %s158_s26, 2048  ;;  %p644_p1 = scmp.lt.s32.totalorder %s158_s26, %s158_s26 }
  0x21   : > { %p637_p9 = scmp.ne.s32.totalorder %s158_s26, %s636_s9  ;;  %p645_p4 = scmp.lt.s32.totalorder %s636_s9, %s636_s9 }
  0x23   : > { %p639_p10 = pnand %p637_p9, %p625_p13  ;;  %p646_p8 = por %p645_p4, %p644_p1 }
  0x25   : > { %p640_p6 = pneg %p639_p10 }
  0x27   : > { %p647_p2 = pnand %p646_p8, %p640_p6 }
  0x29   : > { %650 = shalt.err (!%p647_p2)
}
  0x2a   : > { %s770_s10 = smov 128   ;;  %s771_s11 = smov 8  }
  0x2b   : > { %554 = dma.hbm_to_vmem [thread:$0]  (!%p860_p11), %s1022_s1, 2048, %s158_s26, [#allocation6], %s770_s10, %s770_s10, %s771_s11  }
  0x2c   : > { %p30_p1 = scmp.ge.s32.totalorder %s29_s28, 2  ;;  %s39_s25 = sadd.s32 1, %s755_s14 }
  0x2d   : > { %p46_p2 = scmp.ne.s32.totalorder %s755_s14, %s751_s13  ;;  %p47_p4 = scmp.eq.s32.totalorder %s767_s17, 0 }
  0x2e   : > { %s1050_s28 = smov (%p30_p1, %s29_s28), 0  ;;  %p1036_p8 = scmp.ne.s32.totalorder %s1030_s21, 0 }
  0x2f   : > { %p887_p6 = por %p47_p4, %p46_p2  ;;  %s36_s27 = ssub.s32 %s763_s16, %s1050_s28 }
  0x30   : > { %p893_p10 = por %p1036_p8, %p46_p2  ;;  %p564_p12 = scmp.lt.s32.totalorder %s767_s17, 2 }
  0x31   : > { %p37_p11 = scmp.eq.s32.totalorder %s36_s27, 0  ;;  %s177_s26 = sand.u32 1, %s755_s14  }
  0x32   : > { %s456_s4 = sshll.u32 %s177_s26, 3  ;;  %s457_s6 = sshll.u32 %s763_s16, 7 }
  0x33   : > { %s902_s5 = scalar_select %p37_p11, %s755_s14, %s39_s25  }
  0x34   : > { %s908_s9 = scalar_lea.hbm %s1021_s0, %s457_s6  ;;  %s181_s21 = scalar_lea.vmem [#allocation2], %s456_s4 }
  0x35   : > { %s188_s10 = sshll.u32 %s181_s21, 4  ;;  %p914_p13 = pnand %p564_p12, %p887_p6  ;;  %s910_s10 = int_to_ptr.vmem [resolvable:$true] %s188_s10 }
  0x36   : > { %s178_s18 = scalar_lea.sflag [#allocation3], %s177_s26  ;;  %s651_s19 = scalar_lea.hbm %s908_s9, 128 }
  0x37   : > { %p652_p0 = scmp.ne.s32.totalorder %s908_s9, %s651_s19  ;;  %p653_p3 = pneg %p914_p13 }
  0x38   : > { %s656_s4 = scalar_lea.hbm %s1021_s0, 256  ;;  %p657_p9 = scmp.lt.u32.totalorder %s908_s9, %s1021_s0 }
  0x39   : > { %p654_p5 = pnand %p653_p3, %p652_p0  ;;  %p658_p1 = scmp.lt.u32.totalorder %s656_s4, %s651_s19 }
  0x3a   : > { %p660_p4 = scmp.lt.u32.totalorder %s651_s19, %s908_s9 }
  0x3b   : > { %p655_p7 = pneg %p654_p5  ;;  %p659_p2 = por %p658_p1, %p657_p9 }
  0x3d   : > { %p661_p6 = por %p660_p4, %p659_p2 }
  0x3f   : > { %p662_p8 = pnand %p661_p6, %p655_p7 }
  0x41   : > { %665 = shalt.err (!%p662_p8)
}
  0x42   : > { %s666_s26 = scalar_lea.vmem %s910_s10, 128  ;;  %s772_s7 = smov [#allocation2]  }
  0x43   : > { %p667_p12 = scmp.ne.s32.totalorder %s910_s10, %s666_s26  ;;  %s671_s8 = sshll.u32 %s772_s7, 4  ;;  %s672_s8 = int_to_ptr.vmem [resolvable:$false] %s671_s8 }
  0x44   : > { %s673_s21 = scalar_lea.vmem %s672_s8, 256  ;;  %p674_p5 = scmp.lt.s32.totalorder %s910_s10, %s672_s8 }
  0x45   : > { %p669_p11 = pnand %p667_p12, %p653_p3  ;;  %p675_p9 = scmp.lt.s32.totalorder %s673_s21, %s666_s26 }
  0x47   : > { %p670_p0 = pneg %p669_p11  ;;  %p676_p1 = por %p675_p9, %p674_p5 }
  0x49   : > { %p677_p2 = pnand %p676_p1, %p670_p0 }
  0x4b   : > { %680 = shalt.err (!%p677_p2)
}
  0x4c   : > { %558 = dma.hbm_to_vmem [thread:$0]  (!%p914_p13), %s908_s9, 128, %s910_s10, %s178_s18  }
  0x4d   : > { %p1039_p7 = scmp.ne.s32.totalorder %s1033_s24, 0 }
  0x4e   : > { %s946_s19 = sand.u32 (!%p1039_p7), 1, %s751_s13   ;;  %p1040_p3 = scmp.ne.s32.totalorder (!%p1039_p7), %s1031_s22, 0 }
  0x4f   : > { %197 = sbr.rel (%p1039_p7) target bundleno = 364 (0x16c), region = 32  ;;  %s459_s25 = sshll.u32 (!%p1039_p7), %s946_s19, 3 }
  0x50   : > { %s200_s27 = scalar_lea.sflag (!%p1039_p7), [#allocation3], %s946_s19  ;;  %s952_s4 = scalar_lea.vmem (!%p1039_p7), [#allocation2], %s459_s25 }
  0x56   : > { %734 = dma.done.wait (%p1040_p3), %s200_s27, 128  }
  0x57   : > { %736 = vsyncadd (%p1040_p3), %s200_s27, 4294967168  ;;  %p1041_p13 = scmp.ne.s32.totalorder %s1029_s20, 0 }
  0x59   : > { %738 = dma.done.wait (%p1041_p13), [#allocation6], 2048  }
  0x5a   : > { %740 = vsyncadd (%p1041_p13), [#allocation6], 4294965248  ;;  %v773_v0 = vmov 0.0|0.0   ;;  %vm774_vm0 = vmmov 0   ;;  %v775_v1 = vmov 0.0   ;;  %v237_v2 = vld [vmem:[#allocation5] sm:$0xff] }
  0x5b   : > { %519 = vmatprep.subr.bf16.mxu0 %v773_v0  ;;  %516 = vmatprep.mubr.msk.f32.mxu0 %vm774_vm0, %v775_v1  ;;  %v238_v3 = vld [vmem:[#allocation5 + $0x8] sm:$0xff]  ;;  %v239_v4 = vld [vmem:[#allocation5 + $0x10] sm:$0xff]  ;;  %v240_v6 = vld [vmem:[#allocation5 + $0x18] sm:$0xff]  ;;  %s464_s24 = sshll.u32 %s759_s15, 7  ;;  %s232_s9 = scalar_lea.vmem [#allocation7], %s459_s25 }
  0x5c   : > { %v520_v5 = vpack.c.bf16 %v238_v3, %v237_v2  ;;  %v523_v7 = vpack.c.bf16 %v240_v6, %v239_v4  ;;  %v241_v8 = vld [vmem:[#allocation5 + $0x20] sm:$0xff]  ;;  %v242_v9 = vld [vmem:[#allocation5 + $0x28] sm:$0xff]  ;;  %v243_v11 = vld [vmem:[#allocation5 + $0x30] sm:$0xff]  ;;  %s347_s10 = sshll.u32 %s232_s9, 4  ;;  %s972_s29 = scalar_lea.hbm %s1024_s3, %s464_s24  ;;  %s974_s10 = int_to_ptr.vmem [resolvable:$true] %s347_s10 }
  0x5d   : > { %v526_v10 = vpack.c.bf16 %v242_v9, %v241_v8  ;;  %v244_v12 = vld [vmem:[#allocation5 + $0x38] sm:$0xff]  ;;  %v245_v14 = vld [vmem:[#allocation5 + $0x40] sm:$0xff]  ;;  %v246_v15 = vld [vmem:[#allocation5 + $0x48] sm:$0xff]  ;;  %s333_s6 = scalar_lea.sflag [#allocation4], %s946_s19  ;;  %s681_s26 = scalar_lea.vmem %s974_s10, 128 }
  0x5e   : > { %521 = vmatpush3.bf16.msra.mxu0 %v520_v5  ;;  %v529_v13 = vpack.c.bf16 %v244_v12, %v243_v11  ;;  %v532_v16 = vpack.c.bf16 %v246_v15, %v245_v14  ;;  %v247_v17 = vld [vmem:[#allocation5 + $0x50] sm:$0xff]  ;;  %v248_v18 = vld [vmem:[#allocation5 + $0x58] sm:$0xff]  ;;  %v249_v20 = vld [vmem:[#allocation5 + $0x60] sm:$0xff]  ;;  %p682_p4 = scmp.ne.s32.totalorder %s974_s10, %s681_s26  ;;  %s776_s15 = smov [#allocation7]  }
  0x5f   : > { %522 = vmatprep.subr.bf16.mxu0 %v773_v0  ;;  %v535_v19 = vpack.c.bf16 %v248_v18, %v247_v17  ;;  %v250_v21 = vld [vmem:[#allocation5 + $0x68] sm:$0xff]  ;;  %v251_v23 = vld [vmem:[#allocation5 + $0x70] sm:$0xff]  ;;  %v252_v24 = vld [vmem:[#allocation5 + $0x78] sm:$0xff]  ;;  %s685_s7 = sshll.u32 %s776_s15, 4  ;;  %s686_s7 = int_to_ptr.vmem [resolvable:$false] %s685_s7 }
  0x60   : > { %v538_v22 = vpack.c.bf16 %v250_v21, %v249_v20  ;;  %v541_v25 = vpack.c.bf16 %v252_v24, %v251_v23  ;;  %v236_v26 = vld [vmem:[%s952_s4] sm:$0xff]  ;;  %p683_p6 = pnand %p682_p4, %p893_p10  ;;  %s687_s8 = scalar_lea.vmem %s686_s7, 256 }
  0x61   : > { %v462_v27 = vld [vmem:[%s1023_s2] ss:$0 sm:$0xff]  ;;  %p688_p12 = scmp.lt.s32.totalorder %s974_s10, %s686_s7  ;;  %p689_p11 = scmp.lt.s32.totalorder %s687_s8, %s681_s26 }
  0x62   : > { %524 = vmatpush3.bf16.msra.mxu0 %v523_v7  ;;  %p684_p8 = pneg %p683_p6 }
  0x63   : > { %525 = vmatprep.subr.bf16.mxu0 %v773_v0  ;;  %p690_p0 = por %p689_p11, %p688_p12 }
  0x65   : > { %p691_p5 = pnand %p690_p0, %p684_p8 }
  0x66   : > { %527 = vmatpush3.bf16.msra.mxu0 %v526_v10 }
  0x67   : > { %528 = vmatprep.subr.bf16.mxu0 %v773_v0 }
  0x6a   : > { %530 = vmatpush3.bf16.msra.mxu0 %v529_v13 }
  0x6b   : > { %531 = vmatprep.subr.bf16.mxu0 %v773_v0 }
  0x6e   : > { %533 = vmatpush3.bf16.msra.mxu0 %v532_v16 }
  0x6f   : > { %534 = vmatprep.subr.bf16.mxu0 %v773_v0 }
  0x72   : > { %536 = vmatpush3.bf16.msra.mxu0 %v535_v19 }
  0x73   : > { %537 = vmatprep.subr.bf16.mxu0 %v773_v0 }
  0x76   : > { %539 = vmatpush3.bf16.msra.mxu0 %v538_v22 }
  0x77   : > { %540 = vmatprep.subr.bf16.mxu0 %v773_v0 }
  0x7a   : > { %542 = vmatpush3.bf16.msra.mxu0 %v541_v25 }
  0x7d   : > { %517 = vmatmul.mubr.f32.vlgmr.msra.gmra.mrb[0].mxu0 %v236_v26 }
 0x150   : > { %v326_v28 = vpop.f32.mrb[0].mxu0 }
 0x151   : > { %v327_v29 = vadd.f32 %v462_v27, %v326_v28  ;;  %v518_v30 = vpop.f32.mrb[1].mxu0 }
 0x153   : > { %621 = vtanh.f32 %v327_v29 }
 0x15d   : > { %v622_v31 = vpop.eup %621 }
 0x15e   : > { %331 = vst [vmem:[%s232_s9] sm:$0xff] %v622_v31 }
 0x15f   : > { %694 = shalt.err (!%p691_p5)
}
 0x160   : > { %s695_s21 = scalar_lea.hbm %s972_s29, 128  ;;  %s699_s27 = scalar_lea.hbm %s1024_s3, 256 }
 0x161   : > { %p696_p9 = scmp.ne.s32.totalorder %s972_s29, %s695_s21  ;;  %p700_p7 = scmp.lt.u32.totalorder %s972_s29, %s1024_s3 }
 0x162   : > { %p701_p3 = scmp.lt.u32.totalorder %s699_s27, %s695_s21  ;;  %p703_p4 = scmp.lt.u32.totalorder %s695_s21, %s972_s29 }
 0x163   : > { %p697_p1 = pnand %p696_p9, %p893_p10 }
 0x164   : > { %p702_p13 = por %p701_p3, %p700_p7 }
 0x165   : > { %p698_p2 = pneg %p697_p1 }
 0x166   : > { %p704_p6 = por %p703_p4, %p702_p13 }
 0x168   : > { %p705_p8 = pnand %p704_p6, %p698_p2 }
 0x16a   : > { %708 = shalt.err (!%p705_p8)
}
 0x16b   : > { %549 = dma.vmem_to_hbm [thread:$0]  (%p893_p10), %s974_s10, 128, %s972_s29, %s333_s6  }
 0x16c PF: > { %s359_s22 = sand.u32 1, %s747_s12   ;;  %p1042_p12 = scmp.ne.s32.totalorder %s1032_s23, 0 }
 0x16d   : > { %p1043_p11 = scmp.ge.s32.totalorder %s767_s17, 2  ;;  %s360_s24 = scalar_lea.sflag [#allocation4], %s359_s22 }
 0x16f   : > { %p560_p0 = pnand %p1043_p11, %p1042_p12 }
 0x171   : > { %742 = dma.done.wait (!%p560_p0), %s360_s24, 128  }
 0x172   : > { %744 = vsyncadd (!%p560_p0), %s360_s24, 4294967168  ;;  %s20_s17 = sadd.s32 1, %s767_s17   ;;  %s1044_s12 = smov %s751_s13 }
 0x173   : > { %p17_p5 = scmp.ge.s32.totalorder %s20_s17, 4   ;;  %s1045_s13 = smov %s755_s14 }
 0x174   : > { %s1046_s14 = smov %s902_s5  ;;  %s1047_s15 = smov %s763_s16 }
 0x175   : > { %s1048_s16 = smov %s1050_s28  ;;  %19 = sbr.rel (!%p17_p5) target bundleno = 7 (0x7), region = 85 }
 0x17c   :  { %365 = vsyncpa [#allocation3], 1 }
 0x17d   :  { %367 = vsyncpa [#allocation3 + $0x1], 1 }
 0x17e   :  { %368 = vsyncpa [#allocation6], 1 }
 0x17f   :  { %369 = vsyncpa [#allocation4], 1 }
 0x180   :  { %371 = vsyncpa [#allocation4 + $0x1], 1 }

// kernel: tpu_custom_call.1
= control target key start
LH: loop header
LB: loop body
LE: loop exit
PB: predicated region body
PF: predicated region fallthrough
CT: control target
= control target key end

     0   :  { %8 = vsyncpa [#allocation3], 0  ;;  %s1021_s0 = inlined_call_operand.hbm [shape: f32[16,128], index: 0, kind: input, shape index: {}]   ;;  %s1022_s1 = inlined_call_operand.hbm [shape: f32[128,128], index: 1, kind: input, shape index: {}]   ;;  %s1023_s2 = inlined_call_operand.vmem [shape: f32[1,128], index: 2, kind: input, shape index: {}]   ;;  %s1024_s3 = inlined_call_operand.hbm [shape: f32[16,128], index: 3, kind: output, shape index: {}]  }
   0x1   :  { %10 = vsyncpa [#allocation3 + $0x1], 0 }
   0x2   :  { %11 = vsyncpa [#allocation6], 0 }
   0x3   :  { %12 = vsyncpa [#allocation4], 0 }
   0x4   :  { %14 = vsyncpa [#allocation4 + $0x1], 0  ;;  %s797_s12 = smov 0   ;;  %s799_s13 = smov 0  }
   0x5   :  { %s801_s14 = smov 0   ;;  %s803_s15 = smov 0  }
   0x6   :  { %s805_s16 = smov 0   ;;  %s807_s17 = smov 0  }
   0x7 LB: > { %s450_s18 = sadd.s32 4294967295, %s767_s17   ;;  %s451_s19 = sadd.s32 4294967294, %s767_s17   ;;  %s767_s17 = sphi %s807_s17, %s20_s17   ;;  %s763_s16 = sphi %s805_s16, %s1048_s16   ;;  %s759_s15 = sphi %s803_s15, %s1047_s15   ;;  %s755_s14 = sphi %s801_s14, %s1046_s14   ;;  %s751_s13 = sphi %s799_s13, %s1045_s13   ;;  %s747_s12 = sphi %s797_s12, %s1044_s12  }
   0x8   : > { %p52_p0 = scmp.ne.s32.totalorder %s751_s13, %s747_s12  ;;  %p831_p1 = scmp.eq.s32.totalorder %s450_s18, 0 }
   0x9   : > { %p835_p2 = scmp.eq.s32.totalorder %s450_s18, 1  ;;  %p136_p3 = scmp.eq.s32.totalorder %s451_s19, 1 }
   0xa   : > { %s1029_s20 = scalar_select %p831_p1, 1, 0 }
   0xb   : > { %s1030_s21 = scalar_select %p835_p2, 1, 0 }
   0xc   : > { %p841_p4 = por %p831_p1, %p52_p0  ;;  %p452_p5 = scmp.ge.s32.totalorder %s767_s17, 1 }
   0xd   : > { %p846_p6 = por %p136_p3, %p52_p0  ;;  %p143_p7 = scmp.lt.s32.totalorder %s767_s17, 3 }
   0xe   : > { %s1031_s22 = scalar_select %p841_p4, 1, 0 }
   0xf   : > { %s1032_s23 = scalar_select %p846_p6, 1, 0 }
  0x10   : > { %p851_p8 = pnand %p452_p5, %p143_p7  ;;  %s769_s25 = smov [#allocation5]  }
  0x11   : > { %s157_s26 = sshll.u32 %s769_s25, 4  ;;  %s29_s28 = sadd.s32 1, %s763_s16  ;;  %s158_s26 = int_to_ptr.vmem [resolvable:$true] %s157_s26 }
  0x12   : > { %s1033_s24 = scalar_select %p851_p8, 1, 0 }
  0x13   : > { %p551_p9 = pneg %p851_p8  ;;  %s623_s4 = scalar_lea.hbm %s1022_s1, 2048 }
  0x14   : > { %p624_p12 = scmp.ne.s32.totalorder %s1022_s1, %s623_s4  ;;  %p630_p5 = scmp.lt.u32.totalorder %s623_s4, %s1022_s1 }
  0x15   : > { %p860_p11 = pnand %p551_p9, %p831_p1 }
  0x17   : > { %p625_p13 = pneg %p860_p11 }
  0x19   : > { %p626_p0 = pnand %p625_p13, %p624_p12 }
  0x1b   : > { %p627_p3 = pneg %p626_p0 }
  0x1d   : > { %p632_p7 = pnand %p630_p5, %p627_p3 }
  0x1f   : > { %635 = shalt.err (!%p632_p7)
}
  0x20   : > { %s636_s9 = scalar_lea.vmem %s158_s26, 2048  ;;  %p644_p1 = scmp.lt.s32.totalorder %s158_s26, %s158_s26 }
  0x21   : > { %p637_p9 = scmp.ne.s32.totalorder %s158_s26, %s636_s9  ;;  %p645_p4 = scmp.lt.s32.totalorder %s636_s9, %s636_s9 }
  0x23   : > { %p639_p10 = pnand %p637_p9, %p625_p13  ;;  %p646_p8 = por %p645_p4, %p644_p1 }
  0x25   : > { %p640_p6 = pneg %p639_p10 }
  0x27   : > { %p647_p2 = pnand %p646_p8, %p640_p6 }
  0x29   : > { %650 = shalt.err (!%p647_p2)
}
  0x2a   : > { %s770_s10 = smov 128   ;;  %s771_s11 = smov 8  }
  0x2b   : > { %554 = dma.hbm_to_vmem [thread:$0]  (!%p860_p11), %s1022_s1, 2048, %s158_s26, [#allocation6], %s770_s10, %s770_s10, %s771_s11  }
  0x2c   : > { %p30_p1 = scmp.ge.s32.totalorder %s29_s28, 2  ;;  %s39_s25 = sadd.s32 1, %s755_s14 }
  0x2d   : > { %p46_p2 = scmp.ne.s32.totalorder %s755_s14, %s751_s13  ;;  %p47_p4 = scmp.eq.s32.totalorder %s767_s17, 0 }
  0x2e   : > { %s1050_s28 = smov (%p30_p1, %s29_s28), 0  ;;  %p1036_p8 = scmp.ne.s32.totalorder %s1030_s21, 0 }
  0x2f   : > { %p887_p6 = por %p47_p4, %p46_p2  ;;  %s36_s27 = ssub.s32 %s763_s16, %s1050_s28 }
  0x30   : > { %p893_p10 = por %p1036_p8, %p46_p2  ;;  %p564_p12 = scmp.lt.s32.totalorder %s767_s17, 2 }
  0x31   : > { %p37_p11 = scmp.eq.s32.totalorder %s36_s27, 0  ;;  %s177_s26 = sand.u32 1, %s755_s14  }
  0x32   : > { %s456_s4 = sshll.u32 %s177_s26, 3  ;;  %s457_s6 = sshll.u32 %s763_s16, 7 }
  0x33   : > { %s902_s5 = scalar_select %p37_p11, %s755_s14, %s39_s25  }
  0x34   : > { %s908_s9 = scalar_lea.hbm %s1021_s0, %s457_s6  ;;  %s181_s21 = scalar_lea.vmem [#allocation2], %s456_s4 }
  0x35   : > { %s188_s10 = sshll.u32 %s181_s21, 4  ;;  %p914_p13 = pnand %p564_p12, %p887_p6  ;;  %s910_s10 = int_to_ptr.vmem [resolvable:$true] %s188_s10 }
  0x36   : > { %s178_s18 = scalar_lea.sflag [#allocation3], %s177_s26  ;;  %s651_s19 = scalar_lea.hbm %s908_s9, 128 }
  0x37   : > { %p652_p0 = scmp.ne.s32.totalorder %s908_s9, %s651_s19  ;;  %p653_p3 = pneg %p914_p13 }
  0x38   : > { %s656_s4 = scalar_lea.hbm %s1021_s0, 256  ;;  %p657_p9 = scmp.lt.u32.totalorder %s908_s9, %s1021_s0 }
  0x39   : > { %p654_p5 = pnand %p653_p3, %p652_p0  ;;  %p658_p1 = scmp.lt.u32.totalorder %s656_s4, %s651_s19 }
  0x3a   : > { %p660_p4 = scmp.lt.u32.totalorder %s651_s19, %s908_s9 }
  0x3b   : > { %p655_p7 = pneg %p654_p5  ;;  %p659_p2 = por %p658_p1, %p657_p9 }
  0x3d   : > { %p661_p6 = por %p660_p4, %p659_p2 }
  0x3f   : > { %p662_p8 = pnand %p661_p6, %p655_p7 }
  0x41   : > { %665 = shalt.err (!%p662_p8)
}
  0x42   : > { %s666_s26 = scalar_lea.vmem %s910_s10, 128  ;;  %s772_s7 = smov [#allocation2]  }
  0x43   : > { %p667_p12 = scmp.ne.s32.totalorder %s910_s10, %s666_s26  ;;  %s671_s8 = sshll.u32 %s772_s7, 4  ;;  %s672_s8 = int_to_ptr.vmem [resolvable:$false] %s671_s8 }
  0x44   : > { %s673_s21 = scalar_lea.vmem %s672_s8, 256  ;;  %p674_p5 = scmp.lt.s32.totalorder %s910_s10, %s672_s8 }
  0x45   : > { %p669_p11 = pnand %p667_p12, %p653_p3  ;;  %p675_p9 = scmp.lt.s32.totalorder %s673_s21, %s666_s26 }
  0x47   : > { %p670_p0 = pneg %p669_p11  ;;  %p676_p1 = por %p675_p9, %p674_p5 }
  0x49   : > { %p677_p2 = pnand %p676_p1, %p670_p0 }
  0x4b   : > { %680 = shalt.err (!%p677_p2)
}
  0x4c   : > { %558 = dma.hbm_to_vmem [thread:$0]  (!%p914_p13), %s908_s9, 128, %s910_s10, %s178_s18  }
  0x4d   : > { %p1039_p7 = scmp.ne.s32.totalorder %s1033_s24, 0 }
  0x4e   : > { %s946_s19 = sand.u32 (!%p1039_p7), 1, %s751_s13   ;;  %p1040_p3 = scmp.ne.s32.totalorder (!%p1039_p7), %s1031_s22, 0 }
  0x4f   : > { %197 = sbr.rel (%p1039_p7) target bundleno = 364 (0x16c), region = 32  ;;  %s459_s25 = sshll.u32 (!%p1039_p7), %s946_s19, 3 }
  0x50   : > { %s200_s27 = scalar_lea.sflag (!%p1039_p7), [#allocation3], %s946_s19  ;;  %s952_s4 = scalar_lea.vmem (!%p1039_p7), [#allocation2], %s459_s25 }
  0x56   : > { %734 = dma.done.wait (%p1040_p3), %s200_s27, 128  }
  0x57   : > { %736 = vsyncadd (%p1040_p3), %s200_s27, 4294967168  ;;  %p1041_p13 = scmp.ne.s32.totalorder %s1029_s20, 0 }
  0x59   : > { %738 = dma.done.wait (%p1041_p13), [#allocation6], 2048  }
  0x5a   : > { %740 = vsyncadd (%p1041_p13), [#allocation6], 4294965248  ;;  %v773_v0 = vmov 0.0|0.0   ;;  %vm774_vm0 = vmmov 0   ;;  %v775_v1 = vmov 0.0   ;;  %v237_v2 = vld [vmem:[#allocation5] sm:$0xff] }
  0x5b   : > { %519 = vmatprep.subr.bf16.mxu0 %v773_v0  ;;  %516 = vmatprep.mubr.msk.f32.mxu0 %vm774_vm0, %v775_v1  ;;  %v238_v3 = vld [vmem:[#allocation5 + $0x8] sm:$0xff]  ;;  %v239_v4 = vld [vmem:[#allocation5 + $0x10] sm:$0xff]  ;;  %v240_v6 = vld [vmem:[#allocation5 + $0x18] sm:$0xff]  ;;  %s464_s24 = sshll.u32 %s759_s15, 7  ;;  %s232_s9 = scalar_lea.vmem [#allocation7], %s459_s25 }
  0x5c   : > { %v520_v5 = vpack.c.bf16 %v238_v3, %v237_v2  ;;  %v523_v7 = vpack.c.bf16 %v240_v6, %v239_v4  ;;  %v241_v8 = vld [vmem:[#allocation5 + $0x20] sm:$0xff]  ;;  %v242_v9 = vld [vmem:[#allocation5 + $0x28] sm:$0xff]  ;;  %v243_v11 = vld [vmem:[#allocation5 + $0x30] sm:$0xff]  ;;  %s347_s10 = sshll.u32 %s232_s9, 4  ;;  %s972_s29 = scalar_lea.hbm %s1024_s3, %s464_s24  ;;  %s974_s10 = int_to_ptr.vmem [resolvable:$true] %s347_s10 }
  0x5d   : > { %v526_v10 = vpack.c.bf16 %v242_v9, %v241_v8  ;;  %v244_v12 = vld [vmem:[#allocation5 + $0x38] sm:$0xff]  ;;  %v245_v14 = vld [vmem:[#allocation5 + $0x40] sm:$0xff]  ;;  %v246_v15 = vld [vmem:[#allocation5 + $0x48] sm:$0xff]  ;;  %s333_s6 = scalar_lea.sflag [#allocation4], %s946_s19  ;;  %s681_s26 = scalar_lea.vmem %s974_s10, 128 }
  0x5e   : > { %521 = vmatpush3.bf16.msra.mxu0 %v520_v5  ;;  %v529_v13 = vpack.c.bf16 %v244_v12, %v243_v11  ;;  %v532_v16 = vpack.c.bf16 %v246_v15, %v245_v14  ;;  %v247_v17 = vld [vmem:[#allocation5 + $0x50] sm:$0xff]  ;;  %v248_v18 = vld [vmem:[#allocation5 + $0x58] sm:$0xff]  ;;  %v249_v20 = vld [vmem:[#allocation5 + $0x60] sm:$0xff]  ;;  %p682_p4 = scmp.ne.s32.totalorder %s974_s10, %s681_s26  ;;  %s776_s15 = smov [#allocation7]  }
  0x5f   : > { %522 = vmatprep.subr.bf16.mxu0 %v773_v0  ;;  %v535_v19 = vpack.c.bf16 %v248_v18, %v247_v17  ;;  %v250_v21 = vld [vmem:[#allocation5 + $0x68] sm:$0xff]  ;;  %v251_v23 = vld [vmem:[#allocation5 + $0x70] sm:$0xff]  ;;  %v252_v24 = vld [vmem:[#allocation5 + $0x78] sm:$0xff]  ;;  %s685_s7 = sshll.u32 %s776_s15, 4  ;;  %s686_s7 = int_to_ptr.vmem [resolvable:$false] %s685_s7 }
  0x60   : > { %v538_v22 = vpack.c.bf16 %v250_v21, %v249_v20  ;;  %v541_v25 = vpack.c.bf16 %v252_v24, %v251_v23  ;;  %v236_v26 = vld [vmem:[%s952_s4] sm:$0xff]  ;;  %p683_p6 = pnand %p682_p4, %p893_p10  ;;  %s687_s8 = scalar_lea.vmem %s686_s7, 256 }
  0x61   : > { %v462_v27 = vld [vmem:[%s1023_s2] ss:$0 sm:$0xff]  ;;  %p688_p12 = scmp.lt.s32.totalorder %s974_s10, %s686_s7  ;;  %p689_p11 = scmp.lt.s32.totalorder %s687_s8, %s681_s26 }
  0x62   : > { %524 = vmatpush3.bf16.msra.mxu0 %v523_v7  ;;  %p684_p8 = pneg %p683_p6 }
  0x63   : > { %525 = vmatprep.subr.bf16.mxu0 %v773_v0  ;;  %p690_p0 = por %p689_p11, %p688_p12 }
  0x65   : > { %p691_p5 = pnand %p690_p0, %p684_p8 }
  0x66   : > { %527 = vmatpush3.bf16.msra.mxu0 %v526_v10 }
  0x67   : > { %528 = vmatprep.subr.bf16.mxu0 %v773_v0 }
  0x6a   : > { %530 = vmatpush3.bf16.msra.mxu0 %v529_v13 }
  0x6b   : > { %531 = vmatprep.subr.bf16.mxu0 %v773_v0 }
  0x6e   : > { %533 = vmatpush3.bf16.msra.mxu0 %v532_v16 }
  0x6f   : > { %534 = vmatprep.subr.bf16.mxu0 %v773_v0 }
  0x72   : > { %536 = vmatpush3.bf16.msra.mxu0 %v535_v19 }
  0x73   : > { %537 = vmatprep.subr.bf16.mxu0 %v773_v0 }
  0x76   : > { %539 = vmatpush3.bf16.msra.mxu0 %v538_v22 }
  0x77   : > { %540 = vmatprep.subr.bf16.mxu0 %v773_v0 }
  0x7a   : > { %542 = vmatpush3.bf16.msra.mxu0 %v541_v25 }
  0x7d   : > { %517 = vmatmul.mubr.f32.vlgmr.msra.gmra.mrb[0].mxu0 %v236_v26 }
 0x150   : > { %v326_v28 = vpop.f32.mrb[0].mxu0 }
 0x151   : > { %v327_v29 = vadd.f32 %v462_v27, %v326_v28  ;;  %v518_v30 = vpop.f32.mrb[1].mxu0 }
 0x153   : > { %621 = vtanh.f32 %v327_v29 }
 0x15d   : > { %v622_v31 = vpop.eup %621 }
 0x15e   : > { %331 = vst [vmem:[%s232_s9] sm:$0xff] %v622_v31 }
 0x15f   : > { %694 = shalt.err (!%p691_p5)
}
 0x160   : > { %s695_s21 = scalar_lea.hbm %s972_s29, 128  ;;  %s699_s27 = scalar_lea.hbm %s1024_s3, 256 }
 0x161   : > { %p696_p9 = scmp.ne.s32.totalorder %s972_s29, %s695_s21  ;;  %p700_p7 = scmp.lt.u32.totalorder %s972_s29, %s1024_s3 }
 0x162   : > { %p701_p3 = scmp.lt.u32.totalorder %s699_s27, %s695_s21  ;;  %p703_p4 = scmp.lt.u32.totalorder %s695_s21, %s972_s29 }
 0x163   : > { %p697_p1 = pnand %p696_p9, %p893_p10 }
 0x164   : > { %p702_p13 = por %p701_p3, %p700_p7 }
 0x165   : > { %p698_p2 = pneg %p697_p1 }
 0x166   : > { %p704_p6 = por %p703_p4, %p702_p13 }
 0x168   : > { %p705_p8 = pnand %p704_p6, %p698_p2 }
 0x16a   : > { %708 = shalt.err (!%p705_p8)
}
 0x16b   : > { %549 = dma.vmem_to_hbm [thread:$0]  (%p893_p10), %s974_s10, 128, %s972_s29, %s333_s6  }
 0x16c PF: > { %s359_s22 = sand.u32 1, %s747_s12   ;;  %p1042_p12 = scmp.ne.s32.totalorder %s1032_s23, 0 }
 0x16d   : > { %p1043_p11 = scmp.ge.s32.totalorder %s767_s17, 2  ;;  %s360_s24 = scalar_lea.sflag [#allocation4], %s359_s22 }
 0x16f   : > { %p560_p0 = pnand %p1043_p11, %p1042_p12 }
 0x171   : > { %742 = dma.done.wait (!%p560_p0), %s360_s24, 128  }
 0x172   : > { %744 = vsyncadd (!%p560_p0), %s360_s24, 4294967168  ;;  %s20_s17 = sadd.s32 1, %s767_s17   ;;  %s1044_s12 = smov %s751_s13 }
 0x173   : > { %p17_p5 = scmp.ge.s32.totalorder %s20_s17, 4   ;;  %s1045_s13 = smov %s755_s14 }
 0x174   : > { %s1046_s14 = smov %s902_s5  ;;  %s1047_s15 = smov %s763_s16 }
 0x175   : > { %s1048_s16 = smov %s1050_s28  ;;  %19 = sbr.rel (!%p17_p5) target bundleno = 7 (0x7), region = 85 }
 0x17c   :  { %365 = vsyncpa [#allocation3], 1 }
 0x17d   :  { %367 = vsyncpa [#allocation3 + $0x1], 1 }
 0x17e   :  { %368 = vsyncpa [#allocation6], 1 }
 0x17f   :  { %369 = vsyncpa [#allocation4], 1 }
 0x180   :  { %371 = vsyncpa [#allocation4 + $0x1], 1 }

</bundles_post_ra>
